<compile_context>
chip_gen: v7x
topology: tpu7x:2x2x1
jax: 0.10.0
libtpu: 0.0.40
codegen_flags: <defaults>
</compile_context>

<pallas_src>
import jax
import jax.numpy as jnp
from jax.experimental import pallas as pl
from jax.experimental.pallas import tpu as pltpu

_SEQ_VMEM_BUDGET = 16 << 20  # bytes allowed for the double-buffered seq blocks


def _avg_readout_masked_kernel(inv_ref, seq_ref, msk_ref, out_ref, acc_ref):
    # inv_ref: (1, 1) f32 in SMEM (hoisted 1 / sum(msk))
    # seq_ref: (B, tn, th) VMEM tile; msk_ref: (B, tn); out_ref: (B, th)
    # acc_ref: (B, th) f32 VMEM scratch, resident across the N (reduction) axis
    k = pl.program_id(1)

    @pl.when(k == 0)
    def _():
        acc_ref[...] = jnp.zeros_like(acc_ref)

    seq = seq_ref[...].astype(jnp.float32)
    msk = msk_ref[...].astype(jnp.float32)
    acc_ref[...] += jnp.sum(seq * msk[:, :, None], axis=1)

    @pl.when(k == pl.num_programs(1) - 1)
    def _():
        out_ref[...] = (acc_ref[...] * inv_ref[0, 0]).astype(out_ref.dtype)


def _make_mean_kernel(inv_n):
    # inv_n is a Python float closed over at trace time (no SMEM load needed).
    def kernel(seq_ref, out_ref, acc_ref):
        k = pl.program_id(1)

        @pl.when(k == 0)
        def _():
            acc_ref[...] = jnp.zeros_like(acc_ref)

        acc_ref[...] += jnp.sum(seq_ref[...].astype(jnp.float32), axis=1)

        @pl.when(k == pl.num_programs(1) - 1)
        def _():
            out_ref[...] = (acc_ref[...] * inv_n).astype(out_ref.dtype)

    return kernel


def _pick_tiles(B, N, H, itemsize):
    """(th, tn): lane-dense hidden tile + node tile that fits the VMEM budget."""
    # Hidden tile: full H if small, else a big multiple of 128 (lane-dense stores).
    th = H if H <= 128 else min((H // 128) * 128, 1024)
    per_node = 2 * B * th * itemsize  # double-buffered bytes per node row of seq
    if per_node * N <= _SEQ_VMEM_BUDGET:
        return th, N
    # Tile N: tn must be a multiple of 128 (mask block last-dim rule) and divide
    # N exactly so out-of-bounds padding never enters the node reduction.
    max_tn = min((_SEQ_VMEM_BUDGET // per_node) // 128 * 128, (N // 128) * 128)
    for tn in range(max_tn, 127, -128):
        if N % tn == 0:
            return th, tn
    return th, N  # no clean divisor: single big block, raised vmem limit


def avg_readout(seq, msk=None, *, tile_h=None, tile_n=None):
    """Pallas implementation of AvgReadout.forward(seq, msk). seq: (B, N, H)."""
    B, N, H = seq.shape
    itemsize = jnp.dtype(seq.dtype).itemsize
    th, tn = _pick_tiles(B, N, H, itemsize)
    if tile_h is not None:  # explicit override (must be a 128-multiple if < H)
        th = min(tile_h, H)
    if tile_n is not None:
        tn = min(tile_n, N)

    grid = (pl.cdiv(H, th), pl.cdiv(N, tn))

    # Size the scoped VMEM limit from the real footprint (double-buffered
    # inputs/outputs + f32 accumulator), capped below v7x's 64 MiB physical.
    block_bytes = (
        2 * B * tn * (th + 1) * itemsize  # seq + msk blocks, double-buffered
        + 2 * B * th * itemsize           # output blocks
        + B * th * 4                      # f32 accumulator scratch
    )
    compiler_params = pltpu.CompilerParams(
        dimension_semantics=("parallel", "arbitrary"),
        vmem_limit_bytes=int(min(64 << 20, max(2 * block_bytes, 32 << 20))),
    )

    out_shape = jax.ShapeDtypeStruct((B, H), seq.dtype)
    seq_spec = pl.BlockSpec((B, tn, th), lambda j, k: (0, k, j))
    out_spec = pl.BlockSpec((B, th), lambda j, k: (0, j))
    scratch = [pltpu.VMEM((B, th), jnp.float32)]

    if msk is None:
        return pl.pallas_call(
            _make_mean_kernel(1.0 / N),
            out_shape=out_shape,
            grid=grid,
            in_specs=[seq_spec],
            out_specs=out_spec,
            scratch_shapes=scratch,
            compiler_params=compiler_params,
        )(seq)

    # Hoisted global denominator: one tiny (B, N) reduction + reciprocal in the
    # wrapper, handed to every grid step as a single f32 SMEM scalar.
    inv_denom = (1.0 / jnp.sum(msk.astype(jnp.float32))).reshape(1, 1)
    msk = msk.astype(seq.dtype)
    return pl.pallas_call(
        _avg_readout_masked_kernel,
        out_shape=out_shape,
        grid=grid,
        in_specs=[
            pl.BlockSpec(memory_space=pltpu.MemorySpace.SMEM),  # inv_denom
            seq_spec,
            pl.BlockSpec((B, tn), lambda j, k: (0, k)),
        ],
        out_specs=out_spec,
        scratch_shapes=scratch,
        compiler_params=compiler_params,
    )(inv_denom, seq, msk)


if __name__ == "__main__":
    key = jax.random.PRNGKey(0)
    k_seq, k_msk = jax.random.split(key)

    B, N, H = 2, 8, 32
    seq = jax.random.normal(k_seq, (B, N, H), dtype=jnp.float32)
    msk = (jax.random.uniform(k_msk, (B, N)) > 0.3).astype(jnp.float32)

    # Masked path
    out_masked = jax.block_until_ready(avg_readout(seq, msk))
    ref_masked = jnp.sum(seq * msk[:, :, None], axis=1) / jnp.sum(msk)
    assert out_masked.shape == (B, H)
    assert jnp.allclose(out_masked, ref_masked, atol=1e-5, rtol=1e-5)

    # msk=None path (plain mean over nodes)
    out_mean = jax.block_until_ready(avg_readout(seq, None))
    ref_mean = jnp.mean(seq, axis=1)
    assert out_mean.shape == (B, H)
    assert jnp.allclose(out_mean, ref_mean, atol=1e-5, rtol=1e-5)

    print("KERNEL_OK")
</pallas_src>

<mosaic_0001>
module attributes {stable_mosaic.version = 11 : i64} {
  func.func @_avg_readout_masked_kernel(%arg0: i32, %arg1: i32, %arg2: memref<1x1xf32, #tpu.memory_space<smem>>, %arg3: memref<2x8x32xf32, #tpu.memory_space<vmem>>, %arg4: memref<2x8xf32, #tpu.memory_space<vmem>>, %arg5: memref<2x32xf32, #tpu.memory_space<vmem>>, %arg6: memref<2x32xf32, #tpu.memory_space<vmem>>) attributes {dimension_semantics = [#tpu.dimension_semantics<parallel>, #tpu.dimension_semantics<arbitrary>], iteration_bounds = array<i64: 1, 1>, scalar_prefetch = 0 : i64, scratch_operands = 1 : i64, tpu.core_type = #tpu.core_type<tc>, window_params = [{transform_indices = @transform_0, window_bounds = array<i64: 1, 1>}, {transform_indices = @transform_1, window_bounds = array<i64: 2, 8, 32>}, {transform_indices = @transform_2, window_bounds = array<i64: 2, 8>}, {transform_indices = @transform_3, window_bounds = array<i64: 2, 32>}]} {
    %c0_i32 = arith.constant 0 : i32
    %0 = arith.cmpi eq, %arg1, %c0_i32 : i32
    %1 = arith.extui %0 : i1 to i32
    %c0_i32_0 = arith.constant 0 : i32
    %2 = arith.cmpi ne, %1, %c0_i32_0 : i32
    scf.if %2 {
      %cst_11 = arith.constant 0.000000e+00 : f32
      %15 = vector.broadcast %cst_11 : f32 to vector<2x32xf32>
      %c0_12 = arith.constant 0 : index
      %c0_13 = arith.constant 0 : index
      %16 = vector.load %arg6[%c0_12, %c0_13] : memref<2x32xf32, #tpu.memory_space<vmem>>, vector<2x32xf32>
      tpu.vector_store %arg6[%c0_12, %c0_13], %15 {strides = array<i32>} : memref<2x32xf32, #tpu.memory_space<vmem>>, vector<2x32xf32>,
    } else {
    }
    %c0 = arith.constant 0 : index
    %c0_1 = arith.constant 0 : index
    %c0_2 = arith.constant 0 : index
    %3 = vector.load %arg3[%c0, %c0_1, %c0_2] : memref<2x8x32xf32, #tpu.memory_space<vmem>>, vector<2x8x32xf32>
    %c0_3 = arith.constant 0 : index
    %c0_4 = arith.constant 0 : index
    %4 = vector.load %arg4[%c0_3, %c0_4] : memref<2x8xf32, #tpu.memory_space<vmem>>, vector<2x8xf32>
    %c0_5 = arith.constant 0 : index
    %c0_6 = arith.constant 0 : index
    %5 = vector.load %arg6[%c0_5, %c0_6] : memref<2x32xf32, #tpu.memory_space<vmem>>, vector<2x32xf32>
    %6 = vector.shape_cast %4 : vector<2x8xf32> to vector<2x8x1xf32>
    %7 = vector.broadcast %6 : vector<2x8x1xf32> to vector<2x8x32xf32>
    %8 = arith.mulf %3, %7 : vector<2x8x32xf32>
    %cst = arith.constant dense<0.000000e+00> : vector<2x32xf32>
    %9 = vector.multi_reduction <add>, %8, %cst [1] : vector<2x8x32xf32> to vector<2x32xf32>
    %10 = arith.addf %5, %9 : vector<2x32xf32>
    %c0_7 = arith.constant 0 : index
    %c0_8 = arith.constant 0 : index
    %11 = vector.load %arg6[%c0_7, %c0_8] : memref<2x32xf32, #tpu.memory_space<vmem>>, vector<2x32xf32>
    tpu.vector_store %arg6[%c0_7, %c0_8], %10 {strides = array<i32>} : memref<2x32xf32, #tpu.memory_space<vmem>>, vector<2x32xf32>,
    %c0_i32_9 = arith.constant 0 : i32
    %12 = arith.cmpi eq, %arg1, %c0_i32_9 : i32
    %13 = arith.extui %12 : i1 to i32
    %c0_i32_10 = arith.constant 0 : i32
    %14 = arith.cmpi ne, %13, %c0_i32_10 : i32
    scf.if %14 {
      %c0_11 = arith.constant 0 : index
      %c0_12 = arith.constant 0 : index
      %15 = vector.load %arg6[%c0_11, %c0_12] : memref<2x32xf32, #tpu.memory_space<vmem>>, vector<2x32xf32>
      %c0_13 = arith.constant 0 : index
      %c0_14 = arith.constant 0 : index
      %16 = memref.load %arg2[%c0_13, %c0_14] : memref<1x1xf32, #tpu.memory_space<smem>>
      %17 = vector.broadcast %16 : f32 to vector<2x32xf32>
      %18 = arith.mulf %15, %17 : vector<2x32xf32>
      %c0_15 = arith.constant 0 : index
      %c0_16 = arith.constant 0 : index
      %19 = vector.load %arg5[%c0_15, %c0_16] : memref<2x32xf32, #tpu.memory_space<vmem>>, vector<2x32xf32>
      tpu.vector_store %arg5[%c0_15, %c0_16], %18 {strides = array<i32>} : memref<2x32xf32, #tpu.memory_space<vmem>>, vector<2x32xf32>,
    } else {
    }
    return
  }
  func.func @transform_0(%arg0: i32, %arg1: i32) -> (i32, i32) {
    %c0_i32 = arith.constant 0 : i32
    %c0_i32_0 = arith.constant 0 : i32
    %c0_i32_1 = arith.constant 0 : i32
    return %c0_i32, %c0_i32_0 : i32, i32
  }
  func.func @transform_1(%arg0: i32, %arg1: i32) -> (i32, i32, i32) {
    %c0_i32 = arith.constant 0 : i32
    %c0_i32_0 = arith.constant 0 : i32
    return %c0_i32, %arg1, %arg0 : i32, i32, i32
  }
  func.func @transform_2(%arg0: i32, %arg1: i32) -> (i32, i32) {
    %c0_i32 = arith.constant 0 : i32
    %c0_i32_0 = arith.constant 0 : i32
    return %c0_i32, %arg1 : i32, i32
  }
  func.func @transform_3(%arg0: i32, %arg1: i32) -> (i32, i32) {
    %c0_i32 = arith.constant 0 : i32
    %c0_i32_0 = arith.constant 0 : i32
    return %c0_i32, %arg0 : i32, i32
  }
}

</mosaic_0001>

<bundles_post_ra>
// kernel: tpu_custom_call.1
= control target key start
LH: loop header
LB: loop body
LE: loop exit
PB: predicated region body
PF: predicated region fallthrough
CT: control target
= control target key end

     0   :  { %9 = vsyncpa [#allocation5], 0  ;;  %s213_s0 = inlined_call_operand.<no memory space> [shape: f32[1,1], index: 0, kind: input, shape index: {}]   ;;  %s214_s1 = inlined_call_operand.hbm [shape: f32[2,8,32], index: 1, kind: input, shape index: {}]   ;;  %s215_s2 = inlined_call_operand.vmem [shape: f32[2,8], index: 2, kind: input, shape index: {}]   ;;  %s216_s3 = inlined_call_operand.hbm [shape: f32[2,32], index: 3, kind: output, shape index: {}]  }
   0x1   :  { %10 = vsyncpa [#allocation6], 0  ;;  %s155_s12 = smov [#allocation4]   ;;  %s107_s16 = scalar_lea.hbm %s214_s1, 256 }
   0x2   :  { %s18_s13 = sshll.u32 %s155_s12, 4  ;;  %p108_p0 = scmp.ne.s32.totalorder %s214_s1, %s107_s16  ;;  %s19_s13 = int_to_ptr.vmem [resolvable:$true] %s18_s13 }
   0x3   :  { %p111_p1 = scmp.lt.u32.totalorder %s107_s16, %s214_s1 }
   0x5   :  { %p113_p2 = pnand %p111_p1, %p108_p0 }
   0x7   :  { %116 = shalt.err (!%p113_p2)
}
   0x8   :  { %s117_s21 = scalar_lea.vmem %s19_s13, 256  ;;  %p122_p4 = scmp.lt.s32.totalorder %s19_s13, %s19_s13 }
   0x9   :  { %p118_p3 = scmp.ne.s32.totalorder %s19_s13, %s117_s21  ;;  %p123_p5 = scmp.lt.s32.totalorder %s117_s21, %s117_s21 }
   0xb   :  { %p124_p6 = por %p123_p5, %p122_p4 }
   0xd   :  { %p125_p7 = pnand %p124_p6, %p118_p3 }
   0xf   :  { %128 = shalt.err (!%p125_p7)
}
  0x10   :  { %s156_s22 = smov 128   ;;  %s157_s23 = smov 8  }
  0x11   :  { %24 = dma.hbm_to_vmem [thread:$0]  %s214_s1, 256, %s19_s13, [#allocation5], %s156_s22, %s156_s22, %s157_s23  }
  0x12   :  { %151 = dma.done.wait [#allocation5], 256  }
  0x13   :  { %152 = vsyncadd [#allocation5], 4294967040  ;;  %v40_v0 = vlaneseq  ;;  %v38_v4 = vld [vmem:[%s215_s2] sm:$0x3]  ;;  %vm34_vm0 = vcmask 254976   ;;  %v158_v6 = vmov 0.0   ;;  %v84_v31 = vstv %s213_s0 }
  0x14   :  { %35 = vst.msk [vmem:[#allocation2] sm:$0x3] %vm34_vm0, %v158_v6  ;;  %v36_v8 = vld [vmem:[#allocation4] sm:$0xff]  ;;  %vm56_vm1 = vcmask 261120   ;;  %v37_v11 = vld [vmem:[#allocation4 + $0x8] sm:$0xff]  ;;  %vm73_vm2 = vcmask 1041409  }
  0x15   :  { %v41_v1 = vshrl.u32 %v40_v0, 7  ;;  %s159_s28 = smov [#allocation7]  }
  0x16   :  { %s93_s29 = sshll.u32 %s159_s28, 4  ;;  %s94_s29 = int_to_ptr.vmem [resolvable:$true] %s93_s29 }
  0x17   :  { %v42_v2 = vsub.s32 0, %v41_v1  ;;  %v49_v3 = vsub.s32 1, %v41_v1  ;;  %s129_s30 = scalar_lea.vmem %s94_s29, 32  ;;  %p134_p9 = scmp.lt.s32.totalorder %s94_s29, %s94_s29 }
  0x18   :  { %p130_p8 = scmp.ne.s32.totalorder %s94_s29, %s129_s30  ;;  %p135_p10 = scmp.lt.s32.totalorder %s129_s30, %s129_s30 }
  0x19   :  { %v43_v5 = vrot.slane %v38_v4, %v42_v2  ;;  %v50_v7 = vrot.slane %v38_v4, %v49_v3 }
  0x1a   :  { %p136_p11 = por %p135_p10, %p134_p9 }
  0x1b   :  { %45 = vbcast.lane.b32.xlu0 %v43_v5, 256  ;;  %v39_v28 = vld [vmem:[#allocation2] sm:$0x3] }
  0x1c   :  { %p137_p12 = pnand %p136_p11, %p130_p8 }
  0x1f   :  { %52 = vbcast.lane.b32.xlu0 %v50_v7, 256 }
  0x8d   :  { %v46_v9 = vpop.permute.xlu0 %45 }
  0x8e   :  { %v54_v10 = vmul.f32 %v46_v9, %v36_v8 }
  0x90   :  { %v57_v12 = vsel %vm56_vm1, %v54_v10, 0.0 }
  0x91   :  { %v58_v13 = vrot.slane %v57_v12, 4  ;;  %v53_v14 = vpop.permute.xlu0 %52 }
  0x92   :  { %v55_v15 = vmul.f32 %v53_v14, %v37_v11 }
  0x93   :  { %v59_v16 = vadd.f32 %v58_v13, %v57_v12 }
  0x94   :  { %v64_v17 = vsel %vm56_vm1, %v55_v15, 0.0 }
  0x95   :  { %v60_v18 = vrot.slane %v59_v16, 2  ;;  %v65_v19 = vrot.slane %v64_v17, 4 }
  0x97   :  { %v61_v20 = vadd.f32 %v60_v18, %v59_v16  ;;  %v66_v21 = vadd.f32 %v65_v19, %v64_v17 }
  0x99   :  { %v67_v22 = vrot.slane %v66_v21, 2  ;;  %v62_v23 = vrot.slane %v61_v20, 1 }
  0x9b   :  { %v68_v24 = vadd.f32 %v67_v22, %v66_v21  ;;  %v63_v26 = vadd.f32 %v62_v23, %v61_v20 }
  0x9d   :  { %v69_v25 = vrot.slane %v68_v24, 1 }
  0x9f   :  { %v70_v27 = vadd.f32 %v69_v25, %v68_v24 }
  0xa1   :  { %v74_v29 = vsel %vm73_vm2, %v70_v27, %v63_v26 }
  0xa2   :  { %v76_v30 = vadd.f32 %v74_v29, %v39_v28 }
  0xa4   :  { %78 = vst.msk [vmem:[#allocation2] sm:$0x3] %vm34_vm0, %v76_v30 }
  0xab   :  { %v82_v32 = vld [vmem:[#allocation2] sm:$0x3] }
  0xac   :  { %v85_v33 = vmul.f32 %v84_v31, %v82_v32 }
  0xae   :  { %86 = vst.msk [vmem:[#allocation7] sm:$0x3] %vm34_vm0, %v85_v33 }
  0xaf   :  { %140 = shalt.err (!%p137_p12)
}
  0xb0   :  { %s141_s6 = scalar_lea.hbm %s216_s3, 32 }
  0xb1   :  { %p142_p13 = scmp.ne.s32.totalorder %s216_s3, %s141_s6  ;;  %p145_p0 = scmp.lt.u32.totalorder %s141_s6, %s216_s3 }
  0xb3   :  { %p147_p1 = pnand %p145_p0, %p142_p13 }
  0xb5   :  { %150 = shalt.err (!%p147_p1)
}
  0xb6   :  { %96 = dma.vmem_to_hbm [thread:$0]  %s94_s29, 32, %s216_s3, [#allocation6]  }
  0xb7   :  { %153 = dma.done.wait [#allocation6], 32  }
  0xb8   :  { %154 = vsyncadd [#allocation6], 4294967264 }
  0xb9   :  { %100 = vsyncpa [#allocation5], 1 }
  0xba   :  { %101 = vsyncpa [#allocation6], 1 }

</bundles_post_ra>
